<compile_context>
chip_gen: v6e
topology: v6e:2x2x1
jax: 0.10.0
libtpu: 0.0.40
codegen_flags: <defaults>
</compile_context>

<pallas_src>
import jax
import jax.numpy as jnp
from jax.experimental import pallas as pl
from jax.experimental.pallas import tpu as pltpu


def _round_up(n: int, m: int) -> int:
    return ((n + m - 1) // m) * m


def fused_linear_kernel(x_ref, w_ref, b_ref, o_ref):
    # (TB, F) @ (F, C) on the MXU with f32 accumulation, plus broadcast bias.
    acc = jnp.dot(x_ref[...], w_ref[...], preferred_element_type=jnp.float32)
    o_ref[...] = (acc + b_ref[...]).astype(o_ref.dtype)


def regression_model_forward(x, w1, b1, w2, b2, *,
                             compute_dtype=jnp.float32, tb=2048):
    """Eval-mode forward of RegressionModel as one fused Pallas matmul.

    x:  (B, F)        float32
    w1: (F, 8), b1: (1, 8), w2: (8, C), b2: (1, C)   -- (in, out) layout
    compute_dtype: dtype fed to the MXU (f32 or bf16); accumulation is f32.
    tb: batch tile size (rows per grid step).
    """
    B, F = x.shape
    C = w2.shape[1]

    # Algebraic fusion (exact under eval-mode dropout).
    w_fused = (w1 @ w2).astype(compute_dtype)                 # (F, C)
    b_fused = (b1 @ w2 + b2).astype(jnp.float32)              # (1, C)
    x_c = x.astype(compute_dtype)

    # Batch tiling: TB multiple of 8 (sublane rule); pad B up to a TB multiple.
    TB = min(tb, _round_up(B, 8))
    Bp = _round_up(B, TB)
    if Bp != B:
        x_c = jnp.pad(x_c, ((0, Bp - B), (0, 0)))
    grid = (pl.cdiv(Bp, TB),)

    itemsize = jnp.dtype(compute_dtype).itemsize
    cost = pl.CostEstimate(
        flops=2 * Bp * F * C,
        transcendentals=0,
        bytes_accessed=Bp * F * itemsize + F * C * itemsize
                       + C * 4 + Bp * C * 4,
    )

    out = pl.pallas_call(
        fused_linear_kernel,
        out_shape=jax.ShapeDtypeStruct((Bp, C), jnp.float32),
        grid=grid,
        in_specs=[
            pl.BlockSpec((TB, F), lambda i: (i, 0)),   # x tile, streamed
            pl.BlockSpec((F, C), lambda i: (0, 0)),    # fused weight, resident
            pl.BlockSpec((1, C), lambda i: (0, 0)),    # fused bias, resident
        ],
        out_specs=pl.BlockSpec((TB, C), lambda i: (i, 0)),
        compiler_params=pltpu.CompilerParams(
            dimension_semantics=("parallel",),
        ),
        cost_estimate=cost,
    )(x_c, w_fused, b_fused)

    return out[:B]


def _reference(x, w1, b1, w2, b2):
    return (x @ w1 + b1) @ w2 + b2


if __name__ == "__main__":
    num_feature = 32
    hidden = 8          # fixed by the module definition
    num_classes = 4

    key = jax.random.PRNGKey(0)
    kx, k1, kb1, k2, kb2, kx2 = jax.random.split(key, 6)

    # PyTorch-style uniform(-1/sqrt(fan_in), 1/sqrt(fan_in)) init, (in, out) layout.
    bound1 = 1.0 / jnp.sqrt(num_feature)
    bound2 = 1.0 / jnp.sqrt(hidden)
    w1 = jax.random.uniform(k1, (num_feature, hidden), jnp.float32, -bound1, bound1)
    b1 = jax.random.uniform(kb1, (1, hidden), jnp.float32, -bound1, bound1)
    w2 = jax.random.uniform(k2, (hidden, num_classes), jnp.float32, -bound2, bound2)
    b2 = jax.random.uniform(kb2, (1, num_classes), jnp.float32, -bound2, bound2)

    # --- Small batch, f32 compute: exact check against the reference. ---
    batch = 8
    x = jax.random.normal(kx, (batch, num_feature), dtype=jnp.float32)
    out = regression_model_forward(x, w1, b1, w2, b2,
                                   compute_dtype=jnp.float32)
    out = jax.block_until_ready(out)
    ref = _reference(x, w1, b1, w2, b2)
    assert out.shape == (batch, num_classes)
    assert jnp.allclose(out, ref, atol=1e-5, rtol=1e-5)

    # --- Larger, non-multiple batch, bf16 compute: exercises the batch grid,
    #     padding path, and the reduced-precision streaming variant. ---
    batch2 = 600
    x2 = jax.random.normal(kx2, (batch2, num_feature), dtype=jnp.float32)
    out2 = regression_model_forward(x2, w1, b1, w2, b2,
                                    compute_dtype=jnp.bfloat16, tb=256)
    out2 = jax.block_until_ready(out2)
    ref2 = _reference(x2, w1, b1, w2, b2)
    assert out2.shape == (batch2, num_classes)
    assert jnp.allclose(out2, ref2, atol=3e-2, rtol=3e-2)

    print("KERNEL_OK")
</pallas_src>

<mosaic_0001>
module attributes {stable_mosaic.version = 11 : i64} {
  func.func @fused_linear_kernel(%arg0: i32, %arg1: memref<8x32xf32, #tpu.memory_space<vmem>>, %arg2: memref<32x4xf32, #tpu.memory_space<vmem>>, %arg3: memref<1x4xf32, #tpu.memory_space<vmem>>, %arg4: memref<8x4xf32, #tpu.memory_space<vmem>>) attributes {dimension_semantics = [#tpu.dimension_semantics<parallel>], iteration_bounds = array<i64: 1>, scalar_prefetch = 0 : i64, scratch_operands = 0 : i64, tpu.core_type = #tpu.core_type<tc>, window_params = [{transform_indices = @transform_0, window_bounds = array<i64: 8, 32>}, {pipeline_mode = #tpu.pipeline_mode<synchronous>, transform_indices = @transform_1, window_bounds = array<i64: 32, 4>}, {pipeline_mode = #tpu.pipeline_mode<synchronous>, transform_indices = @transform_2, window_bounds = array<i64: 1, 4>}, {transform_indices = @transform_3, window_bounds = array<i64: 8, 4>}]} {
    %c0 = arith.constant 0 : index
    %c0_0 = arith.constant 0 : index
    %0 = vector.load %arg1[%c0, %c0_0] : memref<8x32xf32, #tpu.memory_space<vmem>>, vector<8x32xf32>
    %c0_1 = arith.constant 0 : index
    %c0_2 = arith.constant 0 : index
    %1 = vector.load %arg2[%c0_1, %c0_2] : memref<32x4xf32, #tpu.memory_space<vmem>>, vector<32x4xf32>
    %cst = arith.constant dense<0.000000e+00> : vector<8x4xf32>
    %2 = tpu.matmul %0, %1, %cst {dimension_numbers = #tpu.dot_dimension_numbers<[1], [0], [0], [1], [0, 0, 1, 1], [], []>} : vector<8x32xf32>, vector<32x4xf32>, vector<8x4xf32> -> vector<8x4xf32>
    %c0_3 = arith.constant 0 : index
    %c0_4 = arith.constant 0 : index
    %3 = vector.load %arg3[%c0_3, %c0_4] : memref<1x4xf32, #tpu.memory_space<vmem>>, vector<1x4xf32>
    %4 = vector.broadcast %3 : vector<1x4xf32> to vector<8x4xf32>
    %5 = arith.addf %2, %4 : vector<8x4xf32>
    %c0_5 = arith.constant 0 : index
    %c0_6 = arith.constant 0 : index
    %6 = vector.load %arg4[%c0_5, %c0_6] : memref<8x4xf32, #tpu.memory_space<vmem>>, vector<8x4xf32>
    tpu.vector_store %arg4[%c0_5, %c0_6], %5 {strides = array<i32>} : memref<8x4xf32, #tpu.memory_space<vmem>>, vector<8x4xf32>,
    return
  }
  func.func @transform_0(%arg0: i32) -> (i32, i32) {
    %c0_i32 = arith.constant 0 : i32
    %c0_i32_0 = arith.constant 0 : i32
    return %arg0, %c0_i32 : i32, i32
  }
  func.func @transform_1(%arg0: i32) -> (i32, i32) {
    %c0_i32 = arith.constant 0 : i32
    %c0_i32_0 = arith.constant 0 : i32
    %c0_i32_1 = arith.constant 0 : i32
    return %c0_i32, %c0_i32_0 : i32, i32
  }
  func.func @transform_2(%arg0: i32) -> (i32, i32) {
    %c0_i32 = arith.constant 0 : i32
    %c0_i32_0 = arith.constant 0 : i32
    %c0_i32_1 = arith.constant 0 : i32
    return %c0_i32, %c0_i32_0 : i32, i32
  }
  func.func @transform_3(%arg0: i32) -> (i32, i32) {
    %c0_i32 = arith.constant 0 : i32
    %c0_i32_0 = arith.constant 0 : i32
    return %arg0, %c0_i32 : i32, i32
  }
}

</mosaic_0001>

<bundles_post_ra>
// kernel: tpu_custom_call.1
= control target key start
LH: loop header
LB: loop body
LE: loop exit
PB: predicated region body
PF: predicated region fallthrough
CT: control target
= control target key end

     0   :  { %v126_v0 = vmov 0.0   ;;  %vm127_vm0 = vmmov 0   ;;  %vm26_vm1 = vcmask 261120   ;;  %vm100_vm2 = vcmask 31744   ;;  %s169_s1 = inlined_call_operand.vmem [shape: f32[32,4], index: 1, kind: input, shape index: {}]   ;;  %s170_s0 = inlined_call_operand.vmem [shape: f32[8,32], index: 0, kind: input, shape index: {}]   ;;  %s171_s2 = inlined_call_operand.vmem [shape: f32[1,4], index: 2, kind: input, shape index: {}]   ;;  %s172_s3 = inlined_call_operand.vmem [shape: f32[8,4], index: 3, kind: output, shape index: {}]  }
   0x1   :  { %113 = vmatprep.subr.mxu0 %v126_v0  ;;  %v18_v1 = vld [vmem:[%s169_s1 + $0x18] sm:$0xff]  ;;  %v17_v2 = vld [vmem:[%s169_s1 + $0x10] sm:$0xff]  ;;  %121 = vmatprep.mubr.msk.f32.mxu0 %vm127_vm0, %v126_v0  ;;  %v16_v3 = vld [vmem:[%s169_s1 + $0x8] sm:$0xff] }
   0x2   :  { %114 = vmatpush3.msra.mxu0 %v18_v1  ;;  %v15_v4 = vld [vmem:[%s169_s1] sm:$0xff] }
   0x3   :  { %115 = vmatprep.subr.mxu0 %v126_v0  ;;  %v14_v5 = vld [vmem:[%s170_s0] sm:$0xff] }
   0x4   :  { %116 = vmatpush3.msra.mxu0 %v17_v2  ;;  %v106_v6 = vld [vmem:[%s171_s2] ss:$0 sm:$0xff] }
   0x5   :  { %117 = vmatprep.subr.mxu0 %v126_v0 }
   0x6   :  { %118 = vmatpush3.msra.mxu0 %v16_v3 }
   0x7   :  { %119 = vmatprep.subr.mxu0 %v126_v0 }
   0x8   :  { %120 = vmatpush3.msra.mxu0 %v15_v4 }
   0x9   :  { %122 = vmatmul.mubr.msk.f32.vlgmr.msra.gmra.mxu0 %vm26_vm1, %v14_v5 }
  0xc9   :  { %v96_v7 = vpop.f32.mrf.mxu0 }
  0xca   :  { %v97_v8 = vadd.f32 %v106_v6, %v96_v7 }
  0xcb   :  { %v123_v9 = vpop.f32.mrf.mxu0 }
  0xcc   :  { %101 = vst.msk [vmem:[%s172_s3] sm:$0xff] %vm100_vm2, %v97_v8 }

</bundles_post_ra>
